<compile_context>
chip_gen: v7x
topology: tpu7x:2x2x1
jax: 0.10.0
libtpu: 0.0.40
codegen_flags: <defaults>
</compile_context>

<pallas_src>
import math
import functools

import numpy as np
import jax
import jax.numpy as jnp
from jax.experimental import pallas as pl
from jax.experimental.pallas import tpu as pltpu


# ----------------------------------------------------------------------------
# Pallas kernel: one image per grid step, everything held in vregs.
# ----------------------------------------------------------------------------
def block_kernel(x_ref, masks_ref, w1_ref, b1_ref, w2_ref, wsc_ref, b2sc_ref,
                 out_ref, *, H, W):
    HW = H * W
    h_ch = b1_ref.shape[0]

    x = x_ref[...]                        # (Cin, H*W), raw (shortcut reads this)
    xr = jnp.maximum(x, 0.0)              # relu(x) for the residual branch
    masks = masks_ref[...]                # (9, H*W) tap-validity, loaded ONCE

    taps = [(dy, dx) for dy in (-1, 0, 1) for dx in (-1, 0, 1)]

    def conv3x3(v, w_taps_ref, acc):
        # v: (C, HW) activation; w_taps_ref: (9, Co, C); acc: (Co, HW) f32.
        # tap[c, j] = v[c, j + dy*W + dx] where the target pixel is in-image,
        # else 0.  roll wraps mod HW; the mask zeroes exactly the wrapped /
        # out-of-image lanes, so the result equals a zero-padded 3x3 conv tap.
        for t, (dy, dx) in enumerate(taps):
            s = dy * W + dx
            if s == 0:                    # center tap: no shift, mask is all-ones
                tap = v
            else:
                tap = pltpu.roll(v, (-s) % HW, axis=1) * masks[t:t + 1, :]
            acc = acc + jnp.dot(w_taps_ref[t], tap,
                                preferred_element_type=jnp.float32)
        return acc

    # conv1 + bias + relu
    h1 = conv3x3(xr, w1_ref, jnp.zeros((h_ch, HW), jnp.float32)) + b1_ref[...]
    h1 = jnp.maximum(h1, 0.0)

    # conv2 seeded with the 1x1 shortcut (raw x), bias is fused c2 + c_sc
    acc2 = jnp.dot(wsc_ref[...], x, preferred_element_type=jnp.float32)
    out = conv3x3(h1, w2_ref, acc2) + b2sc_ref[...]

    out_ref[...] = out.astype(out_ref.dtype)   # (Cout, 256): lane-dense store


# ----------------------------------------------------------------------------
# Host-side helpers (weight relayout, tap-validity masks, wrapper)
# ----------------------------------------------------------------------------
def _tap_masks(H, W):
    """(9, H*W) 0/1 validity per 3x3 tap; batch-independent (per-image)."""
    HW = H * W
    j = np.arange(HW)
    h = j // W
    w = j % W
    rows = []
    for dy in (-1, 0, 1):
        for dx in (-1, 0, 1):
            ok = (h + dy >= 0) & (h + dy < H) & (w + dx >= 0) & (w + dx < W)
            rows.append(ok.astype(np.float32))
    return jnp.asarray(np.stack(rows, axis=0))


def make_kernel_params(w1, b1, w2, b2, wsc, bsc):
    """Convert PyTorch-layout (O, I, kh, kw) conv params to kernel layout."""
    h_ch, in_ch = w1.shape[0], w1.shape[1]
    out_ch = w2.shape[0]
    # per-tap weight matrices: w_taps[t] = w[:, :, ky, kx] with t = ky*3 + kx
    w1t = jnp.transpose(w1, (2, 3, 0, 1)).reshape(9, h_ch, in_ch)
    w2t = jnp.transpose(w2, (2, 3, 0, 1)).reshape(9, out_ch, h_ch)
    wscm = wsc.reshape(out_ch, in_ch)                  # 1x1 shortcut conv
    b1c = b1.reshape(h_ch, 1)
    b2scc = (b2 + bsc).reshape(out_ch, 1)              # fused c2 + c_sc bias
    return w1t, b1c, w2t, wscm, b2scc


def block_forward(x_nchw, kparams):
    """x_nchw: (N, Cin, H, W) f32.  Returns (N, Cout, H, W) f32."""
    w1t, b1c, w2t, wscm, b2scc = kparams
    N, Cin, H, W = x_nchw.shape
    HW = H * W
    h_ch = w1t.shape[1]
    Cout = w2t.shape[1]

    masks = _tap_masks(H, W)                           # (9, HW)
    x_flat = x_nchw.reshape(N, Cin, HW)                # free reshape (stays NCHW)

    out_flat = pl.pallas_call(
        functools.partial(block_kernel, H=H, W=W),
        out_shape=jax.ShapeDtypeStruct((N, Cout, HW), jnp.float32),
        grid=(N,),
        in_specs=[
            pl.BlockSpec((None, Cin, HW), lambda n: (n, 0, 0)),   # per-image x
            pl.BlockSpec((9, HW),         lambda n: (0, 0)),      # tap masks
            pl.BlockSpec((9, h_ch, Cin),  lambda n: (0, 0, 0)),   # c1 tap weights
            pl.BlockSpec((h_ch, 1),       lambda n: (0, 0)),      # c1 bias
            pl.BlockSpec((9, Cout, h_ch), lambda n: (0, 0, 0)),   # c2 tap weights
            pl.BlockSpec((Cout, Cin),     lambda n: (0, 0)),      # 1x1 shortcut
            pl.BlockSpec((Cout, 1),       lambda n: (0, 0)),      # fused bias
        ],
        out_specs=pl.BlockSpec((None, Cout, HW), lambda n: (n, 0, 0)),
        compiler_params=pltpu.CompilerParams(
            dimension_semantics=("parallel",)),        # 2nd TC on v7x, DMA overlap
    )(x_flat, masks, w1t, b1c, w2t, wscm, b2scc)

    return out_flat.reshape(N, Cout, H, W)             # free reshape


# ----------------------------------------------------------------------------
# Deterministic parameter construction (matches the torch module's __init__)
# ----------------------------------------------------------------------------
def xavier_uniform(key, shape_oihw, gain=1.0):
    fan_out = shape_oihw[0] * shape_oihw[2] * shape_oihw[3]
    fan_in = shape_oihw[1] * shape_oihw[2] * shape_oihw[3]
    bound = gain * math.sqrt(6.0 / (fan_in + fan_out))
    return jax.random.uniform(key, shape_oihw, jnp.float32, -bound, bound)


def conv_bias(key, shape_oihw):
    fan_in = shape_oihw[1] * shape_oihw[2] * shape_oihw[3]
    bound = 1.0 / math.sqrt(fan_in)
    return jax.random.uniform(key, (shape_oihw[0],), jnp.float32, -bound, bound)


def spectral_normalize(w_oihw, key, n_power_iterations=1, eps=1e-12):
    """torch.nn.utils.spectral_norm semantics: W / sigma(W.reshape(O, -1))."""
    o = w_oihw.shape[0]
    wm = w_oihw.reshape(o, -1)
    u = jax.random.normal(key, (o,), jnp.float32)
    u = u / jnp.maximum(jnp.linalg.norm(u), eps)
    v = None
    for _ in range(n_power_iterations):
        v = wm.T @ u
        v = v / jnp.maximum(jnp.linalg.norm(v), eps)
        u = wm @ v
        u = u / jnp.maximum(jnp.linalg.norm(u), eps)
    sigma = u @ (wm @ v)
    return w_oihw / sigma


# ----------------------------------------------------------------------------
# Pure-JAX reference (NCHW, lax conv) for correctness checking
# ----------------------------------------------------------------------------
def ref_forward(x, w1, b1, w2, b2, wsc, bsc):
    dn = ("NCHW", "OIHW", "NCHW")
    conv = functools.partial(jax.lax.conv_general_dilated,
                             window_strides=(1, 1), dimension_numbers=dn)
    h = jnp.maximum(x, 0.0)
    h = conv(h, w1, padding=[(1, 1), (1, 1)]) + b1.reshape(1, -1, 1, 1)
    h = jnp.maximum(h, 0.0)
    h = conv(h, w2, padding=[(1, 1), (1, 1)]) + b2.reshape(1, -1, 1, 1)
    sc = conv(x, wsc, padding=[(0, 0), (0, 0)]) + bsc.reshape(1, -1, 1, 1)
    return sc + h


if __name__ == "__main__":
    N, in_ch, out_ch, H, W = 2, 4, 8, 16, 16
    h_ch = in_ch  # h_ch=None in the torch module -> h_ch = in_ch

    key = jax.random.PRNGKey(0)
    k = jax.random.split(key, 8)

    # PyTorch-layout (O, I, kh, kw) weights, xavier init per Block._initialize()
    w1 = xavier_uniform(k[0], (h_ch, in_ch, 3, 3), math.sqrt(2.0))
    w2 = xavier_uniform(k[1], (out_ch, h_ch, 3, 3), math.sqrt(2.0))
    wsc = xavier_uniform(k[2], (out_ch, in_ch, 1, 1), 1.0)
    b1 = conv_bias(k[3], (h_ch, in_ch, 3, 3))
    b2 = conv_bias(k[4], (out_ch, h_ch, 3, 3))
    bsc = conv_bias(k[5], (out_ch, in_ch, 1, 1))

    # spectral norm (one power iteration, deterministic u), as utils.spectral_norm
    w1 = spectral_normalize(w1, jax.random.fold_in(key, 100))
    w2 = spectral_normalize(w2, jax.random.fold_in(key, 101))
    wsc = spectral_normalize(wsc, jax.random.fold_in(key, 102))

    x = jax.random.normal(k[6], (N, in_ch, H, W), jnp.float32)

    kparams = make_kernel_params(w1, b1, w2, b2, wsc, bsc)
    out = block_forward(x, kparams)
    out = jax.block_until_ready(out)

    ref = ref_forward(x, w1, b1, w2, b2, wsc, bsc)
    assert out.shape == (N, out_ch, H, W), out.shape
    max_err = float(jnp.max(jnp.abs(out - ref)))
    assert jnp.allclose(out, ref, atol=1e-4, rtol=1e-4), max_err

    print("KERNEL_OK")
</pallas_src>

<mosaic_0001>
module attributes {stable_mosaic.version = 11 : i64} {
  func.func @block_kernel(%arg0: i32, %arg1: memref<1x4x256xf32, #tpu.memory_space<vmem>>, %arg2: memref<9x256xf32, #tpu.memory_space<vmem>>, %arg3: memref<9x4x4xf32, #tpu.memory_space<vmem>>, %arg4: memref<4x1xf32, #tpu.memory_space<vmem>>, %arg5: memref<9x8x4xf32, #tpu.memory_space<vmem>>, %arg6: memref<8x4xf32, #tpu.memory_space<vmem>>, %arg7: memref<8x1xf32, #tpu.memory_space<vmem>>, %arg8: memref<1x8x256xf32, #tpu.memory_space<vmem>>) attributes {dimension_semantics = [#tpu.dimension_semantics<parallel>], iteration_bounds = array<i64: 2>, scalar_prefetch = 0 : i64, scratch_operands = 0 : i64, tpu.core_type = #tpu.core_type<tc>, window_params = [{transform_indices = @transform_0, window_bounds = array<i64: 1, 4, 256>}, {pipeline_mode = #tpu.pipeline_mode<synchronous>, transform_indices = @transform_1, window_bounds = array<i64: 9, 256>}, {pipeline_mode = #tpu.pipeline_mode<synchronous>, transform_indices = @transform_2, window_bounds = array<i64: 9, 4, 4>}, {pipeline_mode = #tpu.pipeline_mode<synchronous>, transform_indices = @transform_3, window_bounds = array<i64: 4, 1>}, {pipeline_mode = #tpu.pipeline_mode<synchronous>, transform_indices = @transform_4, window_bounds = array<i64: 9, 8, 4>}, {pipeline_mode = #tpu.pipeline_mode<synchronous>, transform_indices = @transform_5, window_bounds = array<i64: 8, 4>}, {pipeline_mode = #tpu.pipeline_mode<synchronous>, transform_indices = @transform_6, window_bounds = array<i64: 8, 1>}, {transform_indices = @transform_7, window_bounds = array<i64: 1, 8, 256>}]} {
    %c0 = arith.constant 0 : index
    %c0_0 = arith.constant 0 : index
    %c0_1 = arith.constant 0 : index
    %0 = vector.load %arg1[%c0, %c0_0, %c0_1] : memref<1x4x256xf32, #tpu.memory_space<vmem>>, vector<1x4x256xf32>
    %1 = vector.shape_cast %0 : vector<1x4x256xf32> to vector<4x256xf32>
    %cst = arith.constant 0.000000e+00 : f32
    %2 = vector.broadcast %cst : f32 to vector<4x256xf32>
    %3 = arith.maximumf %1, %2 : vector<4x256xf32>
    %c0_2 = arith.constant 0 : index
    %c0_3 = arith.constant 0 : index
    %4 = vector.load %arg2[%c0_2, %c0_3] : memref<9x256xf32, #tpu.memory_space<vmem>>, vector<9x256xf32>
    %cst_4 = arith.constant 0.000000e+00 : f32
    %5 = vector.broadcast %cst_4 : f32 to vector<4x256xf32>
    %c17_i32 = arith.constant 17 : i32
    %6 = tpu.dynamic_rotate %3 by %c17_i32 dim 1 : vector<4x256xf32>, i32 -> vector<4x256xf32>
    %7 = vector.extract_strided_slice %4 {offsets = [0, 0], sizes = [1, 256], strides = [1, 1]} : vector<9x256xf32> to vector<1x256xf32>
    %8 = vector.broadcast %7 : vector<1x256xf32> to vector<4x256xf32>
    %9 = arith.mulf %6, %8 : vector<4x256xf32>
    %c0_5 = arith.constant 0 : index
    %c0_6 = arith.constant 0 : index
    %c0_7 = arith.constant 0 : index
    %10 = vector.load %arg3[%c0_5, %c0_6, %c0_7] : memref<9x4x4xf32, #tpu.memory_space<vmem>>, vector<1x4x4xf32>
    %11 = vector.shape_cast %10 : vector<1x4x4xf32> to vector<4x4xf32>
    %cst_8 = arith.constant dense<0.000000e+00> : vector<4x256xf32>
    %12 = tpu.matmul %11, %9, %cst_8 {dimension_numbers = #tpu.dot_dimension_numbers<[1], [0], [0], [1], [0, 0, 1, 1], [], []>} : vector<4x4xf32>, vector<4x256xf32>, vector<4x256xf32> -> vector<4x256xf32>
    %13 = arith.addf %5, %12 : vector<4x256xf32>
    %c16_i32 = arith.constant 16 : i32
    %14 = tpu.dynamic_rotate %3 by %c16_i32 dim 1 : vector<4x256xf32>, i32 -> vector<4x256xf32>
    %15 = vector.extract_strided_slice %4 {offsets = [1, 0], sizes = [1, 256], strides = [1, 1]} : vector<9x256xf32> to vector<1x256xf32>
    %16 = vector.broadcast %15 : vector<1x256xf32> to vector<4x256xf32>
    %17 = arith.mulf %14, %16 : vector<4x256xf32>
    %c1 = arith.constant 1 : index
    %c0_9 = arith.constant 0 : index
    %c0_10 = arith.constant 0 : index
    %18 = vector.load %arg3[%c1, %c0_9, %c0_10] : memref<9x4x4xf32, #tpu.memory_space<vmem>>, vector<1x4x4xf32>
    %19 = vector.shape_cast %18 : vector<1x4x4xf32> to vector<4x4xf32>
    %cst_11 = arith.constant dense<0.000000e+00> : vector<4x256xf32>
    %20 = tpu.matmul %19, %17, %cst_11 {dimension_numbers = #tpu.dot_dimension_numbers<[1], [0], [0], [1], [0, 0, 1, 1], [], []>} : vector<4x4xf32>, vector<4x256xf32>, vector<4x256xf32> -> vector<4x256xf32>
    %21 = arith.addf %13, %20 : vector<4x256xf32>
    %c15_i32 = arith.constant 15 : i32
    %22 = tpu.dynamic_rotate %3 by %c15_i32 dim 1 : vector<4x256xf32>, i32 -> vector<4x256xf32>
    %23 = vector.extract_strided_slice %4 {offsets = [2, 0], sizes = [1, 256], strides = [1, 1]} : vector<9x256xf32> to vector<1x256xf32>
    %24 = vector.broadcast %23 : vector<1x256xf32> to vector<4x256xf32>
    %25 = arith.mulf %22, %24 : vector<4x256xf32>
    %c2 = arith.constant 2 : index
    %c0_12 = arith.constant 0 : index
    %c0_13 = arith.constant 0 : index
    %26 = vector.load %arg3[%c2, %c0_12, %c0_13] : memref<9x4x4xf32, #tpu.memory_space<vmem>>, vector<1x4x4xf32>
    %27 = vector.shape_cast %26 : vector<1x4x4xf32> to vector<4x4xf32>
    %cst_14 = arith.constant dense<0.000000e+00> : vector<4x256xf32>
    %28 = tpu.matmul %27, %25, %cst_14 {dimension_numbers = #tpu.dot_dimension_numbers<[1], [0], [0], [1], [0, 0, 1, 1], [], []>} : vector<4x4xf32>, vector<4x256xf32>, vector<4x256xf32> -> vector<4x256xf32>
    %29 = arith.addf %21, %28 : vector<4x256xf32>
    %c1_i32 = arith.constant 1 : i32
    %30 = tpu.dynamic_rotate %3 by %c1_i32 dim 1 : vector<4x256xf32>, i32 -> vector<4x256xf32>
    %31 = vector.extract_strided_slice %4 {offsets = [3, 0], sizes = [1, 256], strides = [1, 1]} : vector<9x256xf32> to vector<1x256xf32>
    %32 = vector.broadcast %31 : vector<1x256xf32> to vector<4x256xf32>
    %33 = arith.mulf %30, %32 : vector<4x256xf32>
    %c3 = arith.constant 3 : index
    %c0_15 = arith.constant 0 : index
    %c0_16 = arith.constant 0 : index
    %34 = vector.load %arg3[%c3, %c0_15, %c0_16] : memref<9x4x4xf32, #tpu.memory_space<vmem>>, vector<1x4x4xf32>
    %35 = vector.shape_cast %34 : vector<1x4x4xf32> to vector<4x4xf32>
    %cst_17 = arith.constant dense<0.000000e+00> : vector<4x256xf32>
    %36 = tpu.matmul %35, %33, %cst_17 {dimension_numbers = #tpu.dot_dimension_numbers<[1], [0], [0], [1], [0, 0, 1, 1], [], []>} : vector<4x4xf32>, vector<4x256xf32>, vector<4x256xf32> -> vector<4x256xf32>
    %37 = arith.addf %29, %36 : vector<4x256xf32>
    %c4 = arith.constant 4 : index
    %c0_18 = arith.constant 0 : index
    %c0_19 = arith.constant 0 : index
    %38 = vector.load %arg3[%c4, %c0_18, %c0_19] : memref<9x4x4xf32, #tpu.memory_space<vmem>>, vector<1x4x4xf32>
    %39 = vector.shape_cast %38 : vector<1x4x4xf32> to vector<4x4xf32>
    %cst_20 = arith.constant dense<0.000000e+00> : vector<4x256xf32>
    %40 = tpu.matmul %39, %3, %cst_20 {dimension_numbers = #tpu.dot_dimension_numbers<[1], [0], [0], [1], [0, 0, 1, 1], [], []>} : vector<4x4xf32>, vector<4x256xf32>, vector<4x256xf32> -> vector<4x256xf32>
    %41 = arith.addf %37, %40 : vector<4x256xf32>
    %c255_i32 = arith.constant 255 : i32
    %42 = tpu.dynamic_rotate %3 by %c255_i32 dim 1 : vector<4x256xf32>, i32 -> vector<4x256xf32>
    %43 = vector.extract_strided_slice %4 {offsets = [5, 0], sizes = [1, 256], strides = [1, 1]} : vector<9x256xf32> to vector<1x256xf32>
    %44 = vector.broadcast %43 : vector<1x256xf32> to vector<4x256xf32>
    %45 = arith.mulf %42, %44 : vector<4x256xf32>
    %c5 = arith.constant 5 : index
    %c0_21 = arith.constant 0 : index
    %c0_22 = arith.constant 0 : index
    %46 = vector.load %arg3[%c5, %c0_21, %c0_22] : memref<9x4x4xf32, #tpu.memory_space<vmem>>, vector<1x4x4xf32>
    %47 = vector.shape_cast %46 : vector<1x4x4xf32> to vector<4x4xf32>
    %cst_23 = arith.constant dense<0.000000e+00> : vector<4x256xf32>
    %48 = tpu.matmul %47, %45, %cst_23 {dimension_numbers = #tpu.dot_dimension_numbers<[1], [0], [0], [1], [0, 0, 1, 1], [], []>} : vector<4x4xf32>, vector<4x256xf32>, vector<4x256xf32> -> vector<4x256xf32>
    %49 = arith.addf %41, %48 : vector<4x256xf32>
    %c241_i32 = arith.constant 241 : i32
    %50 = tpu.dynamic_rotate %3 by %c241_i32 dim 1 : vector<4x256xf32>, i32 -> vector<4x256xf32>
    %51 = vector.extract_strided_slice %4 {offsets = [6, 0], sizes = [1, 256], strides = [1, 1]} : vector<9x256xf32> to vector<1x256xf32>
    %52 = vector.broadcast %51 : vector<1x256xf32> to vector<4x256xf32>
    %53 = arith.mulf %50, %52 : vector<4x256xf32>
    %c6 = arith.constant 6 : index
    %c0_24 = arith.constant 0 : index
    %c0_25 = arith.constant 0 : index
    %54 = vector.load %arg3[%c6, %c0_24, %c0_25] : memref<9x4x4xf32, #tpu.memory_space<vmem>>, vector<1x4x4xf32>
    %55 = vector.shape_cast %54 : vector<1x4x4xf32> to vector<4x4xf32>
    %cst_26 = arith.constant dense<0.000000e+00> : vector<4x256xf32>
    %56 = tpu.matmul %55, %53, %cst_26 {dimension_numbers = #tpu.dot_dimension_numbers<[1], [0], [0], [1], [0, 0, 1, 1], [], []>} : vector<4x4xf32>, vector<4x256xf32>, vector<4x256xf32> -> vector<4x256xf32>
    %57 = arith.addf %49, %56 : vector<4x256xf32>
    %c240_i32 = arith.constant 240 : i32
    %58 = tpu.dynamic_rotate %3 by %c240_i32 dim 1 : vector<4x256xf32>, i32 -> vector<4x256xf32>
    %59 = vector.extract_strided_slice %4 {offsets = [7, 0], sizes = [1, 256], strides = [1, 1]} : vector<9x256xf32> to vector<1x256xf32>
    %60 = vector.broadcast %59 : vector<1x256xf32> to vector<4x256xf32>
    %61 = arith.mulf %58, %60 : vector<4x256xf32>
    %c7 = arith.constant 7 : index
    %c0_27 = arith.constant 0 : index
    %c0_28 = arith.constant 0 : index
    %62 = vector.load %arg3[%c7, %c0_27, %c0_28] : memref<9x4x4xf32, #tpu.memory_space<vmem>>, vector<1x4x4xf32>
    %63 = vector.shape_cast %62 : vector<1x4x4xf32> to vector<4x4xf32>
    %cst_29 = arith.constant dense<0.000000e+00> : vector<4x256xf32>
    %64 = tpu.matmul %63, %61, %cst_29 {dimension_numbers = #tpu.dot_dimension_numbers<[1], [0], [0], [1], [0, 0, 1, 1], [], []>} : vector<4x4xf32>, vector<4x256xf32>, vector<4x256xf32> -> vector<4x256xf32>
    %65 = arith.addf %57, %64 : vector<4x256xf32>
    %c239_i32 = arith.constant 239 : i32
    %66 = tpu.dynamic_rotate %3 by %c239_i32 dim 1 : vector<4x256xf32>, i32 -> vector<4x256xf32>
    %67 = vector.extract_strided_slice %4 {offsets = [8, 0], sizes = [1, 256], strides = [1, 1]} : vector<9x256xf32> to vector<1x256xf32>
    %68 = vector.broadcast %67 : vector<1x256xf32> to vector<4x256xf32>
    %69 = arith.mulf %66, %68 : vector<4x256xf32>
    %c8 = arith.constant 8 : index
    %c0_30 = arith.constant 0 : index
    %c0_31 = arith.constant 0 : index
    %70 = vector.load %arg3[%c8, %c0_30, %c0_31] : memref<9x4x4xf32, #tpu.memory_space<vmem>>, vector<1x4x4xf32>
    %71 = vector.shape_cast %70 : vector<1x4x4xf32> to vector<4x4xf32>
    %cst_32 = arith.constant dense<0.000000e+00> : vector<4x256xf32>
    %72 = tpu.matmul %71, %69, %cst_32 {dimension_numbers = #tpu.dot_dimension_numbers<[1], [0], [0], [1], [0, 0, 1, 1], [], []>} : vector<4x4xf32>, vector<4x256xf32>, vector<4x256xf32> -> vector<4x256xf32>
    %73 = arith.addf %65, %72 : vector<4x256xf32>
    %c0_33 = arith.constant 0 : index
    %c0_34 = arith.constant 0 : index
    %74 = vector.load %arg4[%c0_33, %c0_34] : memref<4x1xf32, #tpu.memory_space<vmem>>, vector<4x1xf32>
    %75 = vector.broadcast %74 : vector<4x1xf32> to vector<4x256xf32>
    %76 = arith.addf %73, %75 : vector<4x256xf32>
    %cst_35 = arith.constant 0.000000e+00 : f32
    %77 = vector.broadcast %cst_35 : f32 to vector<4x256xf32>
    %78 = arith.maximumf %76, %77 : vector<4x256xf32>
    %c0_36 = arith.constant 0 : index
    %c0_37 = arith.constant 0 : index
    %79 = vector.load %arg6[%c0_36, %c0_37] : memref<8x4xf32, #tpu.memory_space<vmem>>, vector<8x4xf32>
    %cst_38 = arith.constant dense<0.000000e+00> : vector<8x256xf32>
    %80 = tpu.matmul %79, %1, %cst_38 {dimension_numbers = #tpu.dot_dimension_numbers<[1], [0], [0], [1], [0, 0, 1, 1], [], []>} : vector<8x4xf32>, vector<4x256xf32>, vector<8x256xf32> -> vector<8x256xf32>
    %c17_i32_39 = arith.constant 17 : i32
    %81 = tpu.dynamic_rotate %78 by %c17_i32_39 dim 1 : vector<4x256xf32>, i32 -> vector<4x256xf32>
    %82 = vector.extract_strided_slice %4 {offsets = [0, 0], sizes = [1, 256], strides = [1, 1]} : vector<9x256xf32> to vector<1x256xf32>
    %83 = vector.broadcast %82 : vector<1x256xf32> to vector<4x256xf32>
    %84 = arith.mulf %81, %83 : vector<4x256xf32>
    %c0_40 = arith.constant 0 : index
    %c0_41 = arith.constant 0 : index
    %c0_42 = arith.constant 0 : index
    %85 = vector.load %arg5[%c0_40, %c0_41, %c0_42] : memref<9x8x4xf32, #tpu.memory_space<vmem>>, vector<1x8x4xf32>
    %86 = vector.shape_cast %85 : vector<1x8x4xf32> to vector<8x4xf32>
    %cst_43 = arith.constant dense<0.000000e+00> : vector<8x256xf32>
    %87 = tpu.matmul %86, %84, %cst_43 {dimension_numbers = #tpu.dot_dimension_numbers<[1], [0], [0], [1], [0, 0, 1, 1], [], []>} : vector<8x4xf32>, vector<4x256xf32>, vector<8x256xf32> -> vector<8x256xf32>
    %88 = arith.addf %80, %87 : vector<8x256xf32>
    %c16_i32_44 = arith.constant 16 : i32
    %89 = tpu.dynamic_rotate %78 by %c16_i32_44 dim 1 : vector<4x256xf32>, i32 -> vector<4x256xf32>
    %90 = vector.extract_strided_slice %4 {offsets = [1, 0], sizes = [1, 256], strides = [1, 1]} : vector<9x256xf32> to vector<1x256xf32>
    %91 = vector.broadcast %90 : vector<1x256xf32> to vector<4x256xf32>
    %92 = arith.mulf %89, %91 : vector<4x256xf32>
    %c1_45 = arith.constant 1 : index
    %c0_46 = arith.constant 0 : index
    %c0_47 = arith.constant 0 : index
    %93 = vector.load %arg5[%c1_45, %c0_46, %c0_47] : memref<9x8x4xf32, #tpu.memory_space<vmem>>, vector<1x8x4xf32>
    %94 = vector.shape_cast %93 : vector<1x8x4xf32> to vector<8x4xf32>
    %cst_48 = arith.constant dense<0.000000e+00> : vector<8x256xf32>
    %95 = tpu.matmul %94, %92, %cst_48 {dimension_numbers = #tpu.dot_dimension_numbers<[1], [0], [0], [1], [0, 0, 1, 1], [], []>} : vector<8x4xf32>, vector<4x256xf32>, vector<8x256xf32> -> vector<8x256xf32>
    %96 = arith.addf %88, %95 : vector<8x256xf32>
    %c15_i32_49 = arith.constant 15 : i32
    %97 = tpu.dynamic_rotate %78 by %c15_i32_49 dim 1 : vector<4x256xf32>, i32 -> vector<4x256xf32>
    %98 = vector.extract_strided_slice %4 {offsets = [2, 0], sizes = [1, 256], strides = [1, 1]} : vector<9x256xf32> to vector<1x256xf32>
    %99 = vector.broadcast %98 : vector<1x256xf32> to vector<4x256xf32>
    %100 = arith.mulf %97, %99 : vector<4x256xf32>
    %c2_50 = arith.constant 2 : index
    %c0_51 = arith.constant 0 : index
    %c0_52 = arith.constant 0 : index
    %101 = vector.load %arg5[%c2_50, %c0_51, %c0_52] : memref<9x8x4xf32, #tpu.memory_space<vmem>>, vector<1x8x4xf32>
    %102 = vector.shape_cast %101 : vector<1x8x4xf32> to vector<8x4xf32>
    %cst_53 = arith.constant dense<0.000000e+00> : vector<8x256xf32>
    %103 = tpu.matmul %102, %100, %cst_53 {dimension_numbers = #tpu.dot_dimension_numbers<[1], [0], [0], [1], [0, 0, 1, 1], [], []>} : vector<8x4xf32>, vector<4x256xf32>, vector<8x256xf32> -> vector<8x256xf32>
    %104 = arith.addf %96, %103 : vector<8x256xf32>
    %c1_i32_54 = arith.constant 1 : i32
    %105 = tpu.dynamic_rotate %78 by %c1_i32_54 dim 1 : vector<4x256xf32>, i32 -> vector<4x256xf32>
    %106 = vector.extract_strided_slice %4 {offsets = [3, 0], sizes = [1, 256], strides = [1, 1]} : vector<9x256xf32> to vector<1x256xf32>
    %107 = vector.broadcast %106 : vector<1x256xf32> to vector<4x256xf32>
    %108 = arith.mulf %105, %107 : vector<4x256xf32>
    %c3_55 = arith.constant 3 : index
    %c0_56 = arith.constant 0 : index
    %c0_57 = arith.constant 0 : index
    %109 = vector.load %arg5[%c3_55, %c0_56, %c0_57] : memref<9x8x4xf32, #tpu.memory_space<vmem>>, vector<1x8x4xf32>
    %110 = vector.shape_cast %109 : vector<1x8x4xf32> to vector<8x4xf32>
    %cst_58 = arith.constant dense<0.000000e+00> : vector<8x256xf32>
    %111 = tpu.matmul %110, %108, %cst_58 {dimension_numbers = #tpu.dot_dimension_numbers<[1], [0], [0], [1], [0, 0, 1, 1], [], []>} : vector<8x4xf32>, vector<4x256xf32>, vector<8x256xf32> -> vector<8x256xf32>
    %112 = arith.addf %104, %111 : vector<8x256xf32>
    %c4_59 = arith.constant 4 : index
    %c0_60 = arith.constant 0 : index
    %c0_61 = arith.constant 0 : index
    %113 = vector.load %arg5[%c4_59, %c0_60, %c0_61] : memref<9x8x4xf32, #tpu.memory_space<vmem>>, vector<1x8x4xf32>
    %114 = vector.shape_cast %113 : vector<1x8x4xf32> to vector<8x4xf32>
    %cst_62 = arith.constant dense<0.000000e+00> : vector<8x256xf32>
    %115 = tpu.matmul %114, %78, %cst_62 {dimension_numbers = #tpu.dot_dimension_numbers<[1], [0], [0], [1], [0, 0, 1, 1], [], []>} : vector<8x4xf32>, vector<4x256xf32>, vector<8x256xf32> -> vector<8x256xf32>
    %116 = arith.addf %112, %115 : vector<8x256xf32>
    %c255_i32_63 = arith.constant 255 : i32
    %117 = tpu.dynamic_rotate %78 by %c255_i32_63 dim 1 : vector<4x256xf32>, i32 -> vector<4x256xf32>
    %118 = vector.extract_strided_slice %4 {offsets = [5, 0], sizes = [1, 256], strides = [1, 1]} : vector<9x256xf32> to vector<1x256xf32>
    %119 = vector.broadcast %118 : vector<1x256xf32> to vector<4x256xf32>
    %120 = arith.mulf %117, %119 : vector<4x256xf32>
    %c5_64 = arith.constant 5 : index
    %c0_65 = arith.constant 0 : index
    %c0_66 = arith.constant 0 : index
    %121 = vector.load %arg5[%c5_64, %c0_65, %c0_66] : memref<9x8x4xf32, #tpu.memory_space<vmem>>, vector<1x8x4xf32>
    %122 = vector.shape_cast %121 : vector<1x8x4xf32> to vector<8x4xf32>
    %cst_67 = arith.constant dense<0.000000e+00> : vector<8x256xf32>
    %123 = tpu.matmul %122, %120, %cst_67 {dimension_numbers = #tpu.dot_dimension_numbers<[1], [0], [0], [1], [0, 0, 1, 1], [], []>} : vector<8x4xf32>, vector<4x256xf32>, vector<8x256xf32> -> vector<8x256xf32>
    %124 = arith.addf %116, %123 : vector<8x256xf32>
    %c241_i32_68 = arith.constant 241 : i32
    %125 = tpu.dynamic_rotate %78 by %c241_i32_68 dim 1 : vector<4x256xf32>, i32 -> vector<4x256xf32>
    %126 = vector.extract_strided_slice %4 {offsets = [6, 0], sizes = [1, 256], strides = [1, 1]} : vector<9x256xf32> to vector<1x256xf32>
    %127 = vector.broadcast %126 : vector<1x256xf32> to vector<4x256xf32>
    %128 = arith.mulf %125, %127 : vector<4x256xf32>
    %c6_69 = arith.constant 6 : index
    %c0_70 = arith.constant 0 : index
    %c0_71 = arith.constant 0 : index
    %129 = vector.load %arg5[%c6_69, %c0_70, %c0_71] : memref<9x8x4xf32, #tpu.memory_space<vmem>>, vector<1x8x4xf32>
    %130 = vector.shape_cast %129 : vector<1x8x4xf32> to vector<8x4xf32>
    %cst_72 = arith.constant dense<0.000000e+00> : vector<8x256xf32>
    %131 = tpu.matmul %130, %128, %cst_72 {dimension_numbers = #tpu.dot_dimension_numbers<[1], [0], [0], [1], [0, 0, 1, 1], [], []>} : vector<8x4xf32>, vector<4x256xf32>, vector<8x256xf32> -> vector<8x256xf32>
    %132 = arith.addf %124, %131 : vector<8x256xf32>
    %c240_i32_73 = arith.constant 240 : i32
    %133 = tpu.dynamic_rotate %78 by %c240_i32_73 dim 1 : vector<4x256xf32>, i32 -> vector<4x256xf32>
    %134 = vector.extract_strided_slice %4 {offsets = [7, 0], sizes = [1, 256], strides = [1, 1]} : vector<9x256xf32> to vector<1x256xf32>
    %135 = vector.broadcast %134 : vector<1x256xf32> to vector<4x256xf32>
    %136 = arith.mulf %133, %135 : vector<4x256xf32>
    %c7_74 = arith.constant 7 : index
    %c0_75 = arith.constant 0 : index
    %c0_76 = arith.constant 0 : index
    %137 = vector.load %arg5[%c7_74, %c0_75, %c0_76] : memref<9x8x4xf32, #tpu.memory_space<vmem>>, vector<1x8x4xf32>
    %138 = vector.shape_cast %137 : vector<1x8x4xf32> to vector<8x4xf32>
    %cst_77 = arith.constant dense<0.000000e+00> : vector<8x256xf32>
    %139 = tpu.matmul %138, %136, %cst_77 {dimension_numbers = #tpu.dot_dimension_numbers<[1], [0], [0], [1], [0, 0, 1, 1], [], []>} : vector<8x4xf32>, vector<4x256xf32>, vector<8x256xf32> -> vector<8x256xf32>
    %140 = arith.addf %132, %139 : vector<8x256xf32>
    %c239_i32_78 = arith.constant 239 : i32
    %141 = tpu.dynamic_rotate %78 by %c239_i32_78 dim 1 : vector<4x256xf32>, i32 -> vector<4x256xf32>
    %142 = vector.extract_strided_slice %4 {offsets = [8, 0], sizes = [1, 256], strides = [1, 1]} : vector<9x256xf32> to vector<1x256xf32>
    %143 = vector.broadcast %142 : vector<1x256xf32> to vector<4x256xf32>
    %144 = arith.mulf %141, %143 : vector<4x256xf32>
    %c8_79 = arith.constant 8 : index
    %c0_80 = arith.constant 0 : index
    %c0_81 = arith.constant 0 : index
    %145 = vector.load %arg5[%c8_79, %c0_80, %c0_81] : memref<9x8x4xf32, #tpu.memory_space<vmem>>, vector<1x8x4xf32>
    %146 = vector.shape_cast %145 : vector<1x8x4xf32> to vector<8x4xf32>
    %cst_82 = arith.constant dense<0.000000e+00> : vector<8x256xf32>
    %147 = tpu.matmul %146, %144, %cst_82 {dimension_numbers = #tpu.dot_dimension_numbers<[1], [0], [0], [1], [0, 0, 1, 1], [], []>} : vector<8x4xf32>, vector<4x256xf32>, vector<8x256xf32> -> vector<8x256xf32>
    %148 = arith.addf %140, %147 : vector<8x256xf32>
    %c0_83 = arith.constant 0 : index
    %c0_84 = arith.constant 0 : index
    %149 = vector.load %arg7[%c0_83, %c0_84] : memref<8x1xf32, #tpu.memory_space<vmem>>, vector<8x1xf32>
    %150 = vector.broadcast %149 : vector<8x1xf32> to vector<8x256xf32>
    %151 = arith.addf %148, %150 : vector<8x256xf32>
    %c0_85 = arith.constant 0 : index
    %c0_86 = arith.constant 0 : index
    %c0_87 = arith.constant 0 : index
    %152 = vector.load %arg8[%c0_85, %c0_86, %c0_87] : memref<1x8x256xf32, #tpu.memory_space<vmem>>, vector<1x8x256xf32>
    %153 = vector.shape_cast %152 : vector<1x8x256xf32> to vector<8x256xf32>
    %154 = vector.shape_cast %151 : vector<8x256xf32> to vector<1x8x256xf32>
    tpu.vector_store %arg8[%c0_85, %c0_86, %c0_87], %154 {strides = array<i32>} : memref<1x8x256xf32, #tpu.memory_space<vmem>>, vector<1x8x256xf32>,
    return
  }
  func.func @transform_0(%arg0: i32) -> (i32, i32, i32) {
    %c0_i32 = arith.constant 0 : i32
    %c0_i32_0 = arith.constant 0 : i32
    %c0_i32_1 = arith.constant 0 : i32
    return %arg0, %c0_i32, %c0_i32_0 : i32, i32, i32
  }
  func.func @transform_1(%arg0: i32) -> (i32, i32) {
    %c0_i32 = arith.constant 0 : i32
    %c0_i32_0 = arith.constant 0 : i32
    %c0_i32_1 = arith.constant 0 : i32
    return %c0_i32, %c0_i32_0 : i32, i32
  }
  func.func @transform_2(%arg0: i32) -> (i32, i32, i32) {
    %c0_i32 = arith.constant 0 : i32
    %c0_i32_0 = arith.constant 0 : i32
    %c0_i32_1 = arith.constant 0 : i32
    %c0_i32_2 = arith.constant 0 : i32
    return %c0_i32, %c0_i32_0, %c0_i32_1 : i32, i32, i32
  }
  func.func @transform_3(%arg0: i32) -> (i32, i32) {
    %c0_i32 = arith.constant 0 : i32
    %c0_i32_0 = arith.constant 0 : i32
    %c0_i32_1 = arith.constant 0 : i32
    return %c0_i32, %c0_i32_0 : i32, i32
  }
  func.func @transform_4(%arg0: i32) -> (i32, i32, i32) {
    %c0_i32 = arith.constant 0 : i32
    %c0_i32_0 = arith.constant 0 : i32
    %c0_i32_1 = arith.constant 0 : i32
    %c0_i32_2 = arith.constant 0 : i32
    return %c0_i32, %c0_i32_0, %c0_i32_1 : i32, i32, i32
  }
  func.func @transform_5(%arg0: i32) -> (i32, i32) {
    %c0_i32 = arith.constant 0 : i32
    %c0_i32_0 = arith.constant 0 : i32
    %c0_i32_1 = arith.constant 0 : i32
    return %c0_i32, %c0_i32_0 : i32, i32
  }
  func.func @transform_6(%arg0: i32) -> (i32, i32) {
    %c0_i32 = arith.constant 0 : i32
    %c0_i32_0 = arith.constant 0 : i32
    %c0_i32_1 = arith.constant 0 : i32
    return %c0_i32, %c0_i32_0 : i32, i32
  }
  func.func @transform_7(%arg0: i32) -> (i32, i32, i32) {
    %c0_i32 = arith.constant 0 : i32
    %c0_i32_0 = arith.constant 0 : i32
    %c0_i32_1 = arith.constant 0 : i32
    return %arg0, %c0_i32, %c0_i32_0 : i32, i32, i32
  }
}

</mosaic_0001>

<bundles_post_ra>
// kernel: tpu_custom_call.1
= control target key start
LH: loop header
LB: loop body
LE: loop exit
PB: predicated region body
PF: predicated region fallthrough
CT: control target
= control target key end

     0   :  { %12 = vsyncpa [#allocation3], 0  ;;  %s2956_s0 = inlined_call_operand.vmem [shape: f32[2,4,256], index: 0, kind: input, shape index: {}]   ;;  %s2957_s1 = inlined_call_operand.vmem [shape: f32[9,256], index: 1, kind: input, shape index: {}]   ;;  %s2958_s2 = inlined_call_operand.vmem [shape: f32[9,4,4], index: 2, kind: input, shape index: {}]   ;;  %s2959_s3 = inlined_call_operand.vmem [shape: f32[4,1], index: 3, kind: input, shape index: {}]   ;;  %s2960_s4 = inlined_call_operand.vmem [shape: f32[9,8,4], index: 4, kind: input, shape index: {}]   ;;  %s2961_s5 = inlined_call_operand.vmem [shape: f32[8,4], index: 5, kind: input, shape index: {}]   ;;  %s2962_s6 = inlined_call_operand.vmem [shape: f32[8,1], index: 6, kind: input, shape index: {}]   ;;  %s2963_s7 = inlined_call_operand.hbm [shape: f32[2,8,256], index: 7, kind: output, shape index: {}]  }
   0x1   :  { %14 = vsyncpa [#allocation3 + $0x1], 0  ;;  %s2456_s24 = smov 0   ;;  %s2458_s25 = smov 0  }
   0x2   :  { %s2460_s26 = smov 0   ;;  %s2462_s27 = smov 0  }
   0x3 LB: > { %s2477_s28 = sadd.s32 4294967295, %s2403_s27   ;;  %s2167_s29 = sadd.s32 4294967294, %s2403_s27   ;;  %s2403_s27 = sphi %s2462_s27, %s2969_s27   ;;  %s2399_s26 = sphi %s2460_s26, %s2968_s26   ;;  %s2395_s25 = sphi %s2458_s25, %s2967_s25   ;;  %s2391_s24 = sphi %s2456_s24, %s2966_s24  }
   0x4   : > { %s2481_s30 = sadd.s32 1, %s2403_s27   ;;  %s179_s8 = sadd.s32 1, %s2399_s26 }
   0x5   : > { %s176_s9 = ssub.s32 %s2403_s27, %s2481_s30  ;;  %p189_p0 = scmp.ne.s32.totalorder %s2399_s26, %s2395_s25 }
   0x6   : > { %p177_p1 = scmp.eq.s32.totalorder %s176_s9, 0  ;;  %p190_p2 = scmp.eq.s32.totalorder %s2477_s28, 1 }
   0x7   : > { %p195_p3 = scmp.ne.s32.totalorder %s2395_s25, %s2391_s24  ;;  %p196_p4 = scmp.eq.s32.totalorder %s2167_s29, 1 }
   0x8   : > { %s2492_s10 = scalar_select %p177_p1, %s2399_s26, %s179_s8  }
   0x9   : > { %p2494_p5 = por %p190_p2, %p189_p0  ;;  %p2498_p6 = por %p196_p4, %p195_p3 }
   0xa   : > { %p2170_p7 = scmp.ge.s32.totalorder %s2403_s27, 1  ;;  %p240_p8 = scmp.lt.s32.totalorder %s2403_s27, 3 }
   0xc   : > { %p241_p9 = pnand %p2170_p7, %p240_p8 }
   0xd   : > { %p272_p10 = scmp.lt.s32.totalorder (!%p241_p9), %s2477_s28, 1  ;;  %v2405_v0 = vmov (!%p241_p9), 0.0   ;;  %s2406_s18 = smov (!%p241_p9), 17   ;;  %v1175_v4 = vld [vmem:[%s2959_s3] sm:$0xf] (!%p241_p9)  ;;  %v2414_v5 = vmov (!%p241_p9), 0   ;;  %v290_v6 = vlaneseq (!%p241_p9) }
   0xe   : > { %244 = sbr.rel (%p241_p9) target bundleno = 857 (0x359), region = 48  ;;  %400 = vmatprep.mubr.f32.mxu0 (!%p241_p9), %v2405_v0  ;;  %1268 = vmatprep.mubr.f32.mxu1 (!%p241_p9), %v2405_v0  ;;  %s2407_s19 = smov (!%p241_p9), 16   ;;  %v2564_v11 = vld [vmem:[%s2957_s1] sm:$0xff] (!%p241_p9)  ;;  %v2569_v12 = vld [vmem:[%s2957_s1 + $0x8] sm:$0xff] (!%p241_p9)  ;;  %vm329_vm2 = vcmask (!%p241_p9), 1043456   ;;  %vm325_vm4 = vcmask (!%p241_p9), 31744  }
   0xf   : > { %s2408_s20 = smov (!%p241_p9), 15   ;;  %s2409_s21 = smov (!%p241_p9), 1   ;;  %2339 = vset.pattern.permute.xlu0 (!%p241_p9), %v2414_v5  ;;  %v2555_v7 = vshrl.u32 (!%p241_p9), %v290_v6, 7  ;;  %v2557_v8 = vand.u32 (!%p241_p9), 127, %v290_v6  ;;  %v2174_v31 = vld [vmem:[%s2958_s2 + $0x4] sm:$0xf] (!%p241_p9) }
  0x10   : > { %s2410_s22 = smov (!%p241_p9), 127   ;;  %s2411_s23 = smov (!%p241_p9), 113   ;;  %v305_v44 = vld [vmem:[%s2958_s2] sm:$0xf] (!%p241_p9)  ;;  %v2181_v49 = vld [vmem:[%s2958_s2 + $0x8] sm:$0xf] (!%p241_p9) }
  0x11   : > { %s2412_s29 = smov (!%p241_p9), 112   ;;  %s2413_s8 = smov (!%p241_p9), 111   ;;  %v297_v9 = vsub.s32 (!%p241_p9), 0, %v2555_v7  ;;  %v315_v10 = vsub.s32 (!%p241_p9), 1, %v2555_v7  ;;  %vm292_vm0 = vcmp.lt.s32.totalorder (!%p241_p9), %v2557_v8, 17  ;;  %vm310_vm1 = vcmp.lt.s32.totalorder (!%p241_p9), %v2557_v8, 16 }
  0x12   : > { %v496_v18 = vsub.s32 (!%p241_p9), 2, %v2555_v7  ;;  %vm491_vm3 = vcmp.lt.s32.totalorder (!%p241_p9), %v2557_v8, 15  ;;  %v597_v34 = vsub.s32 (!%p241_p9), 3, %v2555_v7  ;;  %vm592_vm5 = vcmp.lt.s32.totalorder (!%p241_p9), %v2557_v8, 1  ;;  %v2185_v55 = vld [vmem:[%s2958_s2 + $0xc] sm:$0xf] (!%p241_p9) }
  0x13   : > { %v2574_v15 = vrot.slane (!%p241_p9), %v2569_v12, %v297_v9  ;;  %v2577_v16 = vrot.slane (!%p241_p9), %v2564_v11, %v315_v10  ;;  %v2580_v17 = vrot.slane (!%p241_p9), %v2569_v12, %v315_v10  ;;  %v2584_v19 = vrot.slane (!%p241_p9), %v2564_v11, %v297_v9  ;;  %s269_s16 = sand.u32 (!%p241_p9), 1, %s2395_s25   ;;  %s2255_s9 = sshll.u32 (!%p241_p9), %s2477_s28, 8 }
  0x14   : > { %v2599_v29 = vrot.slane (!%p241_p9), %v2569_v12, %v496_v18  ;;  %v2616_v37 = vrot.slane (!%p241_p9), %v2564_v11, %v496_v18  ;;  %v2623_v40 = vrot.slane (!%p241_p9), %v2569_v12, %v597_v34  ;;  %v2635_v46 = vrot.slane (!%p241_p9), %v2564_v11, %v597_v34  ;;  %v2207_v34 = vld [vmem:[%s2958_s2 + $0x20] sm:$0xf] (!%p241_p9) }
  0x15   : > { %s273_s13 = scalar_select %p272_p10, %s2477_s28, 1  ;;  %v780_v50 = vsub.s32 5, %v2555_v7  ;;  %vm775_vm6 = vcmp.lt.s32.totalorder %v2557_v8, 127  ;;  %v881_v57 = vsub.s32 6, %v2555_v7  ;;  %vm876_vm7 = vcmp.lt.s32.totalorder %v2557_v8, 113 }
  0x16   : > { %v982_v5 = vsub.s32 7, %v2555_v7  ;;  %vm977_vm8 = vcmp.lt.s32.totalorder %v2557_v8, 112  ;;  %vm1078_vm9 = vcmp.lt.s32.totalorder %v2557_v8, 111  ;;  %s2094_s28 = scalar_lea.sflag [#allocation3], %s269_s16 }
  0x17   : > { %s2254_s14 = sshll.u32 %s273_s13, 3  ;;  %v2653_v53 = vrot.slane %v2569_v12, %v780_v50  ;;  %v2667_v60 = vrot.slane %v2564_v11, %v780_v50  ;;  %v2674_v62 = vrot.slane %v2569_v12, %v881_v57  ;;  %v2688_v10 = vrot.slane %v2564_v11, %v881_v57 }
  0x18   : > { %s276_s17 = scalar_lea.vmem %s2956_s0, %s2254_s14  ;;  %v2695_v7 = vrot.slane %v2569_v12, %v982_v5  ;;  %v2708_v12 = vrot.slane %v2564_v11, %v982_v5  ;;  %v2197_v11 = vld [vmem:[%s2958_s2 + $0x18] sm:$0xf] }
  0x19   : > { %v2511_v1 = vld [vmem:[%s276_s17] sm:$0xff]  ;;  %s2171_s17 = sshll.u32 %s269_s16, 4 }
  0x1a   : > { %v2514_v2 = vmax.f32 %v2511_v1, 0.0  ;;  %s271_s13 = scalar_lea.vmem [#allocation2], %s2171_s17 }
  0x1b   : > { %s2108_s14 = sshll.u32 %s271_s13, 4  ;;  %s2916_s14 = int_to_ptr.vmem [resolvable:$true] %s2108_s14 }
  0x1c   : > { %286 = vrot.lane.b32.xlu1 %v2514_v2, %s2406_s18  ;;  %306 = vrot.lane.b32.xlu0 %v2514_v2, %s2407_s19  ;;  %v2522_v3 = vcombine.high %v2514_v2, %v2514_v2 }
  0x20   : > { %288 = vrot.lane.b32.xlu1 %v2522_v3, %s2406_s18  ;;  %308 = vrot.lane.b32.xlu0 %v2522_v3, %s2407_s19 }
  0x24   : > { %489 = vrot.lane.b32.xlu1 %v2522_v3, %s2408_s20  ;;  %487 = vrot.lane.b32.xlu0 %v2514_v2, %s2408_s20 }
  0x28   : > { %590 = vrot.lane.b32.xlu1 %v2522_v3, %s2409_s21  ;;  %588 = vrot.lane.b32.xlu0 %v2514_v2, %s2409_s21 }
  0x2c   : > { %773 = vrot.lane.b32.xlu1 %v2522_v3, %s2410_s22  ;;  %771 = vrot.lane.b32.xlu0 %v2514_v2, %s2410_s22 }
  0x30   : > { %874 = vrot.lane.b32.xlu1 %v2522_v3, %s2411_s23  ;;  %872 = vrot.lane.b32.xlu0 %v2514_v2, %s2411_s23 }
  0x34   : > { %975 = vrot.lane.b32.xlu1 %v2522_v3, %s2412_s29  ;;  %973 = vrot.lane.b32.xlu0 %v2514_v2, %s2412_s29 }
  0x38   : > { %1076 = vrot.lane.b32.xlu1 %v2522_v3, %s2413_s8  ;;  %1074 = vrot.lane.b32.xlu0 %v2514_v2, %s2413_s8 }
  0x3c   : > { %1178 = vperm.xlu0 %2339, %v1175_v4  }
  0x8e   : > { %v287_v13 = vpop.permute.xlu1 %286  ;;  %v307_v14 = vpop.permute.xlu0 %306 }
  0x92   : > { %v289_v20 = vpop.permute.xlu1 %288  ;;  %v309_v21 = vpop.permute.xlu0 %308 }
  0x93   : > { %v293_v22 = vsel %vm292_vm0, %v287_v13, %v289_v20  ;;  %v294_v23 = vsel %vm292_vm0, %v289_v20, %v287_v13  ;;  %v311_v24 = vsel %vm310_vm1, %v307_v14, %v309_v21  ;;  %v312_v25 = vsel %vm310_vm1, %v309_v21, %v307_v14  ;;  %v2193_v20 = vld [vmem:[%s2958_s2 + $0x14] sm:$0xf] }
  0x94   : > { %v304_v26 = vmul.f32 %v2574_v15, %v293_v22  ;;  %v321_v27 = vmul.f32 %v2577_v16, %v312_v25  ;;  %v322_v28 = vmul.f32 %v2580_v17, %v311_v24  ;;  %v303_v30 = vmul.f32 %v2584_v19, %v294_v23  ;;  %v2717_v25 = vld [vmem:[%s2957_s1 + $0x18] ss:$0 sm:$0xff] }
  0x96   : > { %2175 = vmatprep.subr.msk.mxu0 %vm329_vm2, %v322_v28  ;;  %v490_v32 = vpop.permute.xlu1 %489  ;;  %v488_v33 = vpop.permute.xlu0 %487 }
  0x97   : > { %2176 = vmatpush1.msk.msra.mxu0 %vm329_vm2, %v321_v27  ;;  %v492_v35 = vsel %vm491_vm3, %v488_v33, %v490_v32  ;;  %v493_v38 = vsel %vm491_vm3, %v490_v32, %v488_v33  ;;  %v2201_v33 = vld [vmem:[%s2958_s2 + $0x1c] sm:$0xf] }
  0x98   : > { %2177 = vmatmul.mubr.msk.f32.vlgmr.msra.gmra.mrb[0].mxu0 %vm325_vm4, %v2174_v31  ;;  %2178 = vmatprep.subr.msk.mxu0 %vm329_vm2, %v304_v26  ;;  %v503_v36 = vmul.f32 %v2599_v29, %v492_v35  ;;  %v502_v43 = vmul.f32 %v2616_v37, %v493_v38 }
  0x99   : > { %2179 = vmatpush1.msk.msra.mxu0 %vm329_vm2, %v303_v30  ;;  %480 = vmatprep.mubr.f32.mxu0 %v2405_v0  ;;  %v2732_v30 = vld [vmem:[%s2957_s1 + $0x10] ss:$0 sm:$0xff] }
  0x9a   : > { %2182 = vmatprep.subr.msk.mxu0 %vm329_vm2, %v503_v36  ;;  %v591_v39 = vpop.permute.xlu1 %590  ;;  %v589_v41 = vpop.permute.xlu0 %588 }
  0x9b   : > { %v593_v42 = vsel %vm592_vm5, %v589_v41, %v591_v39  ;;  %v594_v47 = vsel %vm592_vm5, %v591_v39, %v589_v41 }
  0x9c   : > { %v604_v45 = vmul.f32 %v2623_v40, %v593_v42  ;;  %v603_v48 = vmul.f32 %v2635_v46, %v594_v47 }
  0x9e   : > { %v774_v51 = vpop.permute.xlu1 %773  ;;  %v772_v52 = vpop.permute.xlu0 %771 }
  0x9f   : > { %v777_v54 = vsel %vm775_vm6, %v774_v51, %v772_v52  ;;  %v776_v61 = vsel %vm775_vm6, %v772_v52, %v774_v51  ;;  %v1276_v52 = vcombine.high %v2511_v1, %v2511_v1 }
  0xa0   : > { %2180 = vmatmul.mubr.msk.f32.vlgmr.msra.gmra.mrb[0].mxu0 %vm325_vm4, %v305_v44  ;;  %v787_v56 = vmul.f32 %v2653_v53, %v777_v54  ;;  %v2083_v44 = vld [vmem:[%s2962_s6] sm:$0xff] }
  0xa1   : > { %2183 = vmatpush1.msk.msra.mxu0 %vm329_vm2, %v502_v43  ;;  %579 = vmatprep.mubr.f32.mxu0 %v2405_v0  ;;  %v1194_v54 = vld [vmem:[%s2960_s4] sm:$0xff] }
  0xa2   : > { %2186 = vmatprep.subr.msk.mxu0 %vm329_vm2, %v604_v45  ;;  %v875_v58 = vpop.permute.xlu1 %874  ;;  %v873_v59 = vpop.permute.xlu0 %872 }
  0xa3   : > { %v878_v63 = vsel %vm876_vm7, %v875_v58, %v873_v59  ;;  %v877_v13 = vsel %vm876_vm7, %v873_v59, %v875_v58 }
  0xa4   : > { %v888_v4 = vmul.f32 %v2674_v62, %v878_v63  ;;  %v887_v18 = vmul.f32 %v2688_v10, %v877_v13  ;;  %v2221_v13 = vld [vmem:[%s2960_s4 + $0x10] sm:$0xff] }
  0xa6   : > { %v976_v6 = vpop.permute.xlu1 %975  ;;  %v974_v9 = vpop.permute.xlu0 %973 }
  0xa7   : > { %v979_v14 = vsel %vm977_vm8, %v976_v6, %v974_v9  ;;  %v978_v24 = vsel %vm977_vm8, %v974_v9, %v976_v6 }
  0xa8   : > { %2184 = vmatmul.mubr.msk.f32.vlgmr.msra.gmra.mrb[0].mxu0 %vm325_vm4, %v2181_v49  ;;  %v989_v21 = vmul.f32 %v2695_v7, %v979_v14  ;;  %v988_v27 = vmul.f32 %v2708_v12, %v978_v24 }
  0xa9   : > { %2187 = vmatpush1.msk.msra.mxu0 %vm329_vm2, %v603_v48  ;;  %680 = vmatprep.mubr.f32.mxu0 %v2405_v0 }
  0xaa   : > { %2190 = vmatprep.subr.msk.mxu0 %vm329_vm2, %v2522_v3  ;;  %v786_v3 = vmul.f32 %v2667_v60, %v776_v61  ;;  %v1077_v22 = vpop.permute.xlu1 %1076  ;;  %v1075_v23 = vpop.permute.xlu0 %1074 }
  0xab   : > { %v1080_v26 = vsel %vm1078_vm9, %v1077_v22, %v1075_v23  ;;  %v1079_v31 = vsel %vm1078_vm9, %v1075_v23, %v1077_v22 }
  0xac   : > { %v1090_v28 = vmul.f32 %v2717_v25, %v1080_v26  ;;  %v1089_v32 = vmul.f32 %v2732_v30, %v1079_v31 }
  0xb0   : > { %2188 = vmatmul.mubr.msk.f32.vlgmr.msra.gmra.mrb[0].mxu0 %vm325_vm4, %v2185_v55 }
  0xb1   : > { %2191 = vmatpush1.msk.msra.mxu0 %vm329_vm2, %v2514_v2  ;;  %762 = vmatprep.mubr.f32.mxu0 %v2405_v0  ;;  %v2189_v2 = vld [vmem:[%s2958_s2 + $0x10] sm:$0xf] }
  0xb2   : > { %2194 = vmatprep.subr.msk.mxu0 %vm329_vm2, %v787_v56 }
  0xb8   : > { %2192 = vmatmul.mubr.msk.f32.vlgmr.msra.gmra.mrb[0].mxu0 %vm325_vm4, %v2189_v2 }
  0xb9   : > { %2195 = vmatpush1.msk.msra.mxu0 %vm329_vm2, %v786_v3  ;;  %863 = vmatprep.mubr.f32.mxu0 %v2405_v0 }
  0xba   : > { %2198 = vmatprep.subr.msk.mxu0 %vm329_vm2, %v888_v4 }
  0xbb   : > { %v1179_v35 = vpop.permute.xlu0 %1178 }
  0xc0   : > { %2196 = vmatmul.mubr.msk.f32.vlgmr.msra.gmra.mrb[0].mxu0 %vm325_vm4, %v2193_v20  ;;  %v2225_v20 = vld [vmem:[%s2960_s4 + $0x18] sm:$0xff] }
  0xc1   : > { %2199 = vmatpush1.msk.msra.mxu0 %vm329_vm2, %v887_v18  ;;  %964 = vmatprep.mubr.f32.mxu0 %v2405_v0 }
  0xc2   : > { %2202 = vmatprep.subr.msk.mxu0 %vm329_vm2, %v989_v21 }
  0xc8   : > { %2200 = vmatmul.mubr.msk.f32.vlgmr.msra.gmra.mrb[0].mxu0 %vm325_vm4, %v2197_v11 }
  0xc9   : > { %2203 = vmatpush1.msk.msra.mxu0 %vm329_vm2, %v988_v27  ;;  %1065 = vmatprep.mubr.f32.mxu0 %v2405_v0 }
  0xca   : > { %2208 = vmatprep.subr.msk.mxu0 %vm329_vm2, %v1090_v28 }
  0xd0   : > { %2204 = vmatmul.mubr.msk.f32.vlgmr.msra.gmra.mrb[0].mxu0 %vm325_vm4, %v2201_v33 }
  0xd1   : > { %2209 = vmatpush1.msk.msra.mxu0 %vm329_vm2, %v1089_v32  ;;  %1166 = vmatprep.mubr.f32.mxu0 %v2405_v0 }
  0xd8   : > { %2210 = vmatmul.mubr.msk.f32.vlgmr.msra.gmra.mrb[0].mxu0 %vm325_vm4, %v2207_v34 }
 0x1ab   : > { %v1168_v36 = vpop.f32.mrb[0].mxu0 }
 0x1ac   : > { %v1181_v38 = vadd.f32 %v1179_v35, %v1168_v36  ;;  %v1170_v39 = vpop.f32.mrb[1].mxu0 }
 0x1ad   : > { %v1182_v42 = vadd.f32 %v1179_v35, %v1170_v39 }
 0x1ae   : > { %v2748_v41 = vmax.f32 %v1181_v38, 0.0 }
 0x1af   : > { %v2754_v43 = vmax.f32 %v1182_v42, 0.0  ;;  %v2241_v42 = vld [vmem:[%s2960_s4 + $0x38] sm:$0xff] }
 0x1b0   : > { %1355 = vrot.lane.b32.xlu0 %v2748_v41, %s2407_s19  ;;  %1186 = vrot.lane.b32.xlu1 %v2748_v41, %s2406_s18 }
 0x1b4   : > { %1447 = vrot.lane.b32.xlu0 %v2748_v41, %s2408_s20  ;;  %1188 = vrot.lane.b32.xlu1 %v2754_v43, %s2406_s18 }
 0x1b8   : > { %1539 = vrot.lane.b32.xlu0 %v2748_v41, %s2409_s21  ;;  %1357 = vrot.lane.b32.xlu1 %v2754_v43, %s2407_s19  ;;  %s2914_s19 = scalar_lea.hbm %s2963_s7, %s2255_s9 }
 0x1bc   : > { %1715 = vrot.lane.b32.xlu0 %v2748_v41, %s2410_s22  ;;  %1449 = vrot.lane.b32.xlu1 %v2754_v43, %s2408_s20  ;;  %s2341_s20 = scalar_lea.vmem %s2916_s14, 256 }
 0x1bd   : > { %p2342_p11 = scmp.ne.s32.totalorder %s2916_s14, %s2341_s20 }
 0x1bf   : > { %p2343_p12 = pnand %p2342_p11, %p2494_p5 }
 0x1c0   : > { %1807 = vrot.lane.b32.xlu0 %v2748_v41, %s2411_s23  ;;  %1541 = vrot.lane.b32.xlu1 %v2754_v43, %s2409_s21  ;;  %s2415_s21 = smov [#allocation2]  }
 0x1c1   : > { %p2344_p13 = pneg %p2343_p12 }
 0x1c4   : > { %1899 = vrot.lane.b32.xlu0 %v2748_v41, %s2412_s29  ;;  %1717 = vrot.lane.b32.xlu1 %v2754_v43, %s2410_s22  ;;  %s2345_s22 = sshll.u32 %s2415_s21, 4  ;;  %s2346_s22 = int_to_ptr.vmem [resolvable:$false] %s2345_s22 }
 0x1c5   : > { %p2348_p0 = scmp.lt.s32.totalorder %s2916_s14, %s2346_s22 }
 0x1c8   : > { %1991 = vrot.lane.b32.xlu0 %v2748_v41, %s2413_s8  ;;  %1809 = vrot.lane.b32.xlu1 %v2754_v43, %s2411_s23  ;;  %s2347_s23 = scalar_lea.vmem %s2346_s22, 512 }
 0x1c9   : > { %p2349_p1 = scmp.lt.s32.totalorder %s2347_s23, %s2341_s20 }
 0x1cb   : > { %p2350_p2 = por %p2349_p1, %p2348_p0 }
 0x1cc   : > { %2086 = vperm.xlu0 %2339, %v2083_v44   ;;  %1901 = vrot.lane.b32.xlu1 %v2754_v43, %s2412_s29 }
 0x1cd   : > { %p2351_p3 = pnand %p2350_p2, %p2344_p13 }
 0x1d0   : > { %1993 = vrot.lane.b32.xlu1 %v2754_v43, %s2413_s8 }
 0x222   : > { %v1187_v45 = vpop.permute.xlu1 %1186  ;;  %v1356_v55 = vpop.permute.xlu0 %1355 }
 0x226   : > { %v1189_v47 = vpop.permute.xlu1 %1188  ;;  %v1448_v58 = vpop.permute.xlu0 %1447 }
 0x227   : > { %v1190_v48 = vsel %vm292_vm0, %v1187_v45, %v1189_v47  ;;  %v1191_v49 = vsel %vm292_vm0, %v1189_v47, %v1187_v45 }
 0x228   : > { %v1192_v50 = vmul.f32 %v1191_v49, %v2584_v19  ;;  %v1193_v51 = vmul.f32 %v1190_v48, %v2574_v15 }
 0x22a   : > { %2211 = vmatprep.subr.msk.mxu1 %vm329_vm2, %v1193_v51  ;;  %v1358_v56 = vpop.permute.xlu1 %1357  ;;  %v1540_v2 = vpop.permute.xlu0 %1539 }
 0x22b   : > { %v1359_v57 = vsel %vm310_vm1, %v1356_v55, %v1358_v56  ;;  %2212 = vmatpush1.msk.msra.mxu1 %vm329_vm2, %v1192_v50  ;;  %v1360_v59 = vsel %vm310_vm1, %v1358_v56, %v1356_v55 }
 0x22c   : > { %v1362_v19 = vmul.f32 %v1359_v57, %v2580_v17  ;;  %2213 = vmatmul.mubr.msk.f32.vlgmr.msra.gmra.mrb[0].mxu1 %vm325_vm4, %v1194_v54  ;;  %2214 = vmatprep.subr.msk.mxu1 %vm329_vm2, %v1276_v52  ;;  %v1185_v17 = vld [vmem:[%s2961_s5] sm:$0xff]  ;;  %v1361_v63 = vmul.f32 %v1360_v59, %v2577_v16  ;;  %v2217_v16 = vld [vmem:[%s2960_s4 + $0x8] sm:$0xff] }
 0x22d   : > { %2215 = vmatpush1.msk.msra.mxu1 %vm329_vm2, %v2511_v1  ;;  %1348 = vmatprep.mubr.f32.mxu1 %v2405_v0 }
 0x22e   : > { %2218 = vmatprep.subr.msk.mxu1 %vm329_vm2, %v1362_v19  ;;  %v1450_v15 = vpop.permute.xlu1 %1449 }
 0x22f   : > { %v1451_v61 = vsel %vm491_vm3, %v1448_v58, %v1450_v15  ;;  %v1452_v4 = vsel %vm491_vm3, %v1450_v15, %v1448_v58 }
 0x230   : > { %v1454_v1 = vmul.f32 %v1451_v61, %v2599_v29  ;;  %v1453_v29 = vmul.f32 %v1452_v4, %v2616_v37 }
 0x232   : > { %v1542_v3 = vpop.permute.xlu1 %1541 }
 0x233   : > { %v1543_v5 = vsel %vm592_vm5, %v1540_v2, %v1542_v3  ;;  %v1544_v9 = vsel %vm592_vm5, %v1542_v3, %v1540_v2 }
 0x234   : > { %2216 = vmatmul.mubr.msk.f32.vlgmr.msra.gmra.mrb[0].mxu1 %vm325_vm4, %v1185_v17  ;;  %v1546_v6 = vmul.f32 %v1543_v5, %v2623_v40  ;;  %v1545_v14 = vmul.f32 %v1544_v9, %v2635_v46  ;;  %v1716_v40 = vpop.permute.xlu0 %1715 }
 0x235   : > { %2219 = vmatpush1.msk.msra.mxu1 %vm329_vm2, %v1361_v63  ;;  %1438 = vmatprep.mubr.f32.mxu1 %v2405_v0 }
 0x236   : > { %2222 = vmatprep.subr.msk.mxu1 %vm329_vm2, %v1454_v1  ;;  %v1718_v37 = vpop.permute.xlu1 %1717 }
 0x237   : > { %v1720_v18 = vsel %vm775_vm6, %v1718_v37, %v1716_v40  ;;  %v1719_v23 = vsel %vm775_vm6, %v1716_v40, %v1718_v37 }
 0x238   : > { %v1722_v46 = vmul.f32 %v1720_v18, %v2653_v53  ;;  %v1808_v22 = vpop.permute.xlu0 %1807  ;;  %v2229_v53 = vld [vmem:[%s2960_s4 + $0x20] sm:$0xff]  ;;  %v1721_v26 = vmul.f32 %v1719_v23, %v2667_v60  ;;  %v2233_v60 = vld [vmem:[%s2960_s4 + $0x28] sm:$0xff] }
 0x23a   : > { %v1810_v21 = vpop.permute.xlu1 %1809 }
 0x23b   : > { %v1812_v24 = vsel %vm876_vm7, %v1810_v21, %v1808_v22  ;;  %v1811_v31 = vsel %vm876_vm7, %v1808_v22, %v1810_v21 }
 0x23c   : > { %2220 = vmatmul.mubr.msk.f32.vlgmr.msra.gmra.mrb[0].mxu1 %vm325_vm4, %v2217_v16  ;;  %v1814_v27 = vmul.f32 %v1812_v24, %v2674_v62  ;;  %v1900_v28 = vpop.permute.xlu0 %1899  ;;  %v1813_v62 = vmul.f32 %v1811_v31, %v2688_v10  ;;  %v2237_v10 = vld [vmem:[%s2960_s4 + $0x30] sm:$0xff] }
 0x23d   : > { %2223 = vmatpush1.msk.msra.mxu1 %vm329_vm2, %v1453_v29  ;;  %1530 = vmatprep.mubr.f32.mxu1 %v2405_v0 }
 0x23e   : > { %2226 = vmatprep.subr.msk.mxu1 %vm329_vm2, %v1546_v6  ;;  %v1902_v11 = vpop.permute.xlu1 %1901 }
 0x23f   : > { %v1904_v32 = vsel %vm977_vm8, %v1902_v11, %v1900_v28  ;;  %v1903_v36 = vsel %vm977_vm8, %v1900_v28, %v1902_v11 }
 0x240   : > { %v1906_v33 = vmul.f32 %v1904_v32, %v2695_v7  ;;  %v1992_v35 = vpop.permute.xlu0 %1991  ;;  %v1905_v7 = vmul.f32 %v1903_v36, %v2708_v12 }
 0x242   : > { %v1994_v34 = vpop.permute.xlu1 %1993 }
 0x243   : > { %v1996_v38 = vsel %vm1078_vm9, %v1994_v34, %v1992_v35 }
 0x244   : > { %2224 = vmatmul.mubr.msk.f32.vlgmr.msra.gmra.mrb[0].mxu1 %vm325_vm4, %v2221_v13  ;;  %v1998_v39 = vmul.f32 %v2717_v25, %v1996_v38  ;;  %v2245_v25 = vld [vmem:[%s2960_s4 + $0x40] sm:$0xff] }
 0x245   : > { %2227 = vmatpush1.msk.msra.mxu1 %vm329_vm2, %v1545_v14  ;;  %1622 = vmatprep.mubr.f32.mxu1 %v2405_v0 }
 0x246   : > { %2230 = vmatprep.subr.msk.mxu1 %vm329_vm2, %v2754_v43 }
 0x24b   : > { %v2087_v8 = vpop.permute.xlu0 %2086 }
 0x24c   : > { %2228 = vmatmul.mubr.msk.f32.vlgmr.msra.gmra.mrb[0].mxu1 %vm325_vm4, %v2225_v20 }
 0x24d   : > { %2231 = vmatpush1.msk.msra.mxu1 %vm329_vm2, %v2748_v41  ;;  %1706 = vmatprep.mubr.f32.mxu1 %v2405_v0  ;;  %v1995_v41 = vsel %vm1078_vm9, %v1992_v35, %v1994_v34 }
 0x24e   : > { %2234 = vmatprep.subr.msk.mxu1 %vm329_vm2, %v1722_v46  ;;  %v1997_v12 = vmul.f32 %v2732_v30, %v1995_v41 }
 0x254   : > { %2232 = vmatmul.mubr.msk.f32.vlgmr.msra.gmra.mrb[0].mxu1 %vm325_vm4, %v2229_v53 }
 0x255   : > { %2235 = vmatpush1.msk.msra.mxu1 %vm329_vm2, %v1721_v26  ;;  %1798 = vmatprep.mubr.f32.mxu1 %v2405_v0 }
 0x256   : > { %2238 = vmatprep.subr.msk.mxu1 %vm329_vm2, %v1814_v27 }
 0x25c   : > { %2236 = vmatmul.mubr.msk.f32.vlgmr.msra.gmra.mrb[0].mxu1 %vm325_vm4, %v2233_v60 }
 0x25d   : > { %2239 = vmatpush1.msk.msra.mxu1 %vm329_vm2, %v1813_v62  ;;  %1890 = vmatprep.mubr.f32.mxu1 %v2405_v0 }
 0x25e   : > { %2242 = vmatprep.subr.msk.mxu1 %vm329_vm2, %v1906_v33 }
 0x264   : > { %2240 = vmatmul.mubr.msk.f32.vlgmr.msra.gmra.mrb[0].mxu1 %vm325_vm4, %v2237_v10 }
 0x265   : > { %2243 = vmatpush1.msk.msra.mxu1 %vm329_vm2, %v1905_v7  ;;  %1982 = vmatprep.mubr.f32.mxu1 %v2405_v0 }
 0x266   : > { %2246 = vmatprep.subr.msk.mxu1 %vm329_vm2, %v1998_v39 }
 0x26c   : > { %2244 = vmatmul.mubr.msk.f32.vlgmr.msra.gmra.mrb[0].mxu1 %vm325_vm4, %v2241_v42 }
 0x26d   : > { %2247 = vmatpush1.msk.msra.mxu1 %vm329_vm2, %v1997_v12  ;;  %2074 = vmatprep.mubr.f32.mxu1 %v2405_v0 }
 0x274   : > { %2248 = vmatmul.mubr.msk.f32.vlgmr.msra.gmra.mrb[0].mxu1 %vm325_vm4, %v2245_v25 }
 0x347   : > { %v2076_v30 = vpop.f32.mrb[0].mxu1 }
 0x348   : > { %v2089_v43 = vadd.f32 %v2087_v8, %v2076_v30  ;;  %v2078_v44 = vpop.f32.mrb[1].mxu1 }
 0x349   : > { %v2090_v45 = vadd.f32 %v2087_v8, %v2078_v44 }
 0x34a   : > { %2091 = vst [vmem:[%s271_s13] sm:$0xff] %v2089_v43 }
 0x34b   : > { %2092 = vst [vmem:[%s271_s13 + $0x8] sm:$0xff] %v2090_v45 }
 0x34c   : > { %2354 = shalt.err (!%p2351_p3)
}
 0x34d   : > { %s2355_s29 = scalar_lea.hbm %s2914_s19, 256  ;;  %s2359_s17 = scalar_lea.hbm %s2963_s7, 512 }
 0x34e   : > { %p2356_p4 = scmp.ne.s32.totalorder %s2914_s19, %s2355_s29  ;;  %p2360_p9 = scmp.lt.u32.totalorder %s2914_s19, %s2963_s7 }
 0x34f   : > { %p2361_p10 = scmp.lt.u32.totalorder %s2359_s17, %s2355_s29  ;;  %p2363_p12 = scmp.lt.u32.totalorder %s2355_s29, %s2914_s19 }
 0x350   : > { %p2357_p7 = pnand %p2356_p4, %p2494_p5 }
 0x351   : > { %p2362_p11 = por %p2361_p10, %p2360_p9 }
 0x352   : > { %p2358_p8 = pneg %p2357_p7 }
 0x353   : > { %p2364_p13 = por %p2363_p12, %p2362_p11 }
 0x355   : > { %p2365_p0 = pnand %p2364_p13, %p2358_p8 }
 0x357   : > { %2368 = shalt.err (!%p2365_p0)
}
 0x358   : > { %2290 = dma.vmem_to_hbm [thread:$0]  (%p2494_p5), %s2916_s14, 256, %s2914_s19, %s2094_s28  }
 0x359 PF: > { %p2296_p1 = scmp.ge.s32.totalorder %s2403_s27, 2  ;;  %s2120_s15 = sand.u32 1, %s2391_s24  }
 0x35a   : > { %s2121_s18 = scalar_lea.sflag [#allocation3], %s2120_s15 }
 0x35b   : > { %p2293_p2 = pnand %p2296_p1, %p2498_p6 }
 0x35d   : > { %2386 = dma.done.wait (!%p2293_p2), %s2121_s18, 256  }
 0x35e   : > { %2388 = vsyncadd (!%p2293_p2), %s2121_s18, 4294967040  ;;  %p17_p3 = scmp.ge.s32.totalorder %s2481_s30, 4   ;;  %s2966_s24 = smov %s2395_s25 }
 0x35f   : > { %s2967_s25 = smov %s2399_s26  ;;  %s2968_s26 = smov %s2492_s10 }
 0x360   : > { %s2969_s27 = smov %s2481_s30  ;;  %19 = sbr.rel (!%p17_p3) target bundleno = 3 (0x3), region = 99 }
 0x367   :  { %2126 = vsyncpa [#allocation3], 1 }
 0x368   :  { %2128 = vsyncpa [#allocation3 + $0x1], 1 }

</bundles_post_ra>
